<compile_context>
chip_gen: v5e
topology: v5e:2x2
jax: 0.10.0
libtpu: 0.0.40
codegen_flags: <defaults>
</compile_context>

<pallas_src>
import math
import numpy as np

import jax
import jax.numpy as jnp
from jax.experimental import pallas as pl
from jax.experimental.pallas import tpu as pltpu

WINDOW_SIZE = 11
SIGMA = 1.5
PAD = WINDOW_SIZE // 2
C1 = 0.01 ** 2
C2 = 0.03 ** 2


def _gaussian_1d(window_size=WINDOW_SIZE, sigma=SIGMA):
    # Mirrors gaussian() in the PyTorch module.
    g = np.array(
        [math.exp(-((x - window_size // 2) ** 2) / (2.0 * sigma ** 2))
         for x in range(window_size)],
        dtype=np.float64,
    )
    return (g / g.sum()).astype(np.float32)


_G1D = _gaussian_1d()


def _band_matrix(n):
    """(n, n) banded matrix B with B[i, i + k - PAD] = g[k].

    B @ x  == 'same'-padded 1-D Gaussian blur of x along axis 0 (zero padding is
    implicit: out-of-range taps simply have no column)."""
    m = np.zeros((n, n), dtype=np.float32)
    for i in range(n):
        for k in range(WINDOW_SIZE):
            j = i + k - PAD
            if 0 <= j < n:
                m[i, j] = _G1D[k]
    return m


def _ssim_kernel(v_ref, gh_ref, x1_ref, x2_ref, out_ref):
    # x1_ref / x2_ref: (H, P*W) slab = P image planes packed along the lane axis.
    V = v_ref[...]          # (H, H)    vertical Gaussian band matrix
    Gh = gh_ref[...]        # (PW, PW)  block-diagonal horizontal band matrix
    x1 = x1_ref[...].astype(jnp.float32)
    x2 = x2_ref[...].astype(jnp.float32)

    def blur(x):
        # Separable Gaussian blur: vertical then horizontal pass, both on the MXU.
        t = jnp.dot(V, x, preferred_element_type=jnp.float32)       # (H, PW)
        return jnp.dot(t, Gh, preferred_element_type=jnp.float32)   # (H, PW)

    mu1 = blur(x1)
    mu2 = blur(x2)
    e11 = blur(x1 * x1)
    e22 = blur(x2 * x2)
    e12 = blur(x1 * x2)

    mu1_sq = mu1 * mu1
    mu2_sq = mu2 * mu2
    mu1_mu2 = mu1 * mu2
    sigma1_sq = e11 - mu1_sq
    sigma2_sq = e22 - mu2_sq
    sigma12 = e12 - mu1_mu2

    num = (2.0 * mu1_mu2 + C1) * (2.0 * sigma12 + C2)
    den = (mu1_sq + mu2_sq + C1) * (sigma1_sq + sigma2_sq + C2)
    ssim_map = num * pl.reciprocal(den, approx=False)

    # Lane-dense partial reduction: per-column sums. Final mean is done in the wrapper,
    # so there is no cross-grid-step dependency and the grid axis can be "parallel".
    out_ref[...] = jnp.sum(ssim_map, axis=0, keepdims=True)          # (1, PW)


def ssim(img1, img2):
    """SSIM.forward(img1, img2) with size_average=True. Inputs are NCHW; returns a scalar."""
    B, C, H, W = img1.shape
    N = B * C

    # Pack P planes along the lane axis so the minor dim is >= ~128 lanes.
    P = 1 if W >= 128 else max(1, 128 // W)
    Ng = -(-N // P)          # number of plane groups (grid size)
    pad_planes = Ng * P - N
    PW = P * W

    x1 = img1.reshape(N, H, W).astype(jnp.float32)
    x2 = img2.reshape(N, H, W).astype(jnp.float32)
    if pad_planes:
        zeros = jnp.zeros((pad_planes, H, W), jnp.float32)
        x1 = jnp.concatenate([x1, zeros], axis=0)
        x2 = jnp.concatenate([x2, zeros], axis=0)

    # (Ng*P, H, W) -> (Ng, H, P*W): plane p of group g lives at lanes [p*W, (p+1)*W).
    x1p = x1.reshape(Ng, P, H, W).transpose(0, 2, 1, 3).reshape(Ng, H, PW)
    x2p = x2.reshape(Ng, P, H, W).transpose(0, 2, 1, 3).reshape(Ng, H, PW)

    # Banded blur matrices (padding folded in). g is symmetric so band == band.T,
    # but keep the orientation explicit.
    Vm = _band_matrix(H)                                   # vertical: V @ x
    Hm = _band_matrix(W).T                                 # horizontal: y @ Hm
    Gh = np.kron(np.eye(P, dtype=np.float32), Hm)          # block-diag over packed planes

    col_sums = pl.pallas_call(
        _ssim_kernel,
        out_shape=jax.ShapeDtypeStruct((Ng, 1, PW), jnp.float32),
        grid_spec=pltpu.PrefetchScalarGridSpec(
            num_scalar_prefetch=0,
            grid=(Ng,),
            in_specs=[
                pl.BlockSpec((H, H), lambda n: (0, 0)),          # V (resident)
                pl.BlockSpec((PW, PW), lambda n: (0, 0)),        # Gh (resident)
                pl.BlockSpec((None, H, PW), lambda n: (n, 0, 0)),
                pl.BlockSpec((None, H, PW), lambda n: (n, 0, 0)),
            ],
            out_specs=pl.BlockSpec((None, 1, PW), lambda n: (n, 0, 0)),
        ),
        compiler_params=pltpu.CompilerParams(
            dimension_semantics=("parallel",),
            vmem_limit_bytes=64 * 1024 * 1024,
        ),
    )(jnp.asarray(Vm), jnp.asarray(Gh), x1p, x2p)

    # (Ng, 1, PW) -> (Ng*P, W): per-plane column sums; drop zero-padded planes,
    # then take the global mean (size_average=True).
    per_plane = col_sums.reshape(Ng * P, W).sum(axis=1)[:N]
    return per_plane.sum() / float(N * H * W)


def ssim_ref(img1, img2):
    """Pure-JAX reference (matches the PyTorch _ssim with size_average=True)."""
    B, C, H, W = img1.shape
    w2d = np.outer(_G1D, _G1D).astype(np.float32)
    w = jnp.tile(jnp.asarray(w2d)[None, None], (C, 1, 1, 1))   # (C,1,11,11) depthwise

    def conv(x):
        return jax.lax.conv_general_dilated(
            x, w, window_strides=(1, 1),
            padding=[(PAD, PAD), (PAD, PAD)],
            dimension_numbers=("NCHW", "OIHW", "NCHW"),
            feature_group_count=C,
            precision=jax.lax.Precision.HIGHEST)

    mu1, mu2 = conv(img1), conv(img2)
    mu1_sq, mu2_sq, mu1_mu2 = mu1 * mu1, mu2 * mu2, mu1 * mu2
    sigma1_sq = conv(img1 * img1) - mu1_sq
    sigma2_sq = conv(img2 * img2) - mu2_sq
    sigma12 = conv(img1 * img2) - mu1_mu2
    ssim_map = ((2 * mu1_mu2 + C1) * (2 * sigma12 + C2)
                / ((mu1_sq + mu2_sq + C1) * (sigma1_sq + sigma2_sq + C2)))
    return ssim_map.mean()


if __name__ == "__main__":
    key = jax.random.PRNGKey(0)
    k1, k2 = jax.random.split(key)
    B, C, H, W = 2, 3, 16, 16
    img1 = jax.random.uniform(k1, (B, C, H, W), dtype=jnp.float32)
    noise = 0.1 * jax.random.normal(k2, (B, C, H, W), dtype=jnp.float32)
    img2 = jnp.clip(img1 + noise, 0.0, 1.0)   # correlated pair -> well-conditioned SSIM

    out = jax.block_until_ready(ssim(img1, img2))
    ref = ssim_ref(img1, img2)
    assert jnp.allclose(out, ref, atol=2e-3, rtol=2e-3), (out, ref)
    print("KERNEL_OK")
</pallas_src>

<mosaic_0001>
module attributes {stable_mosaic.version = 11 : i64} {
  func.func @_ssim_kernel(%arg0: i32, %arg1: memref<16x16xf32, #tpu.memory_space<vmem>>, %arg2: memref<128x128xf32, #tpu.memory_space<vmem>>, %arg3: memref<1x16x128xf32, #tpu.memory_space<vmem>>, %arg4: memref<1x16x128xf32, #tpu.memory_space<vmem>>, %arg5: memref<1x1x128xf32, #tpu.memory_space<vmem>>) attributes {dimension_semantics = [#tpu.dimension_semantics<parallel>], iteration_bounds = array<i64: 1>, scalar_prefetch = 0 : i64, scratch_operands = 0 : i64, tpu.core_type = #tpu.core_type<tc>, window_params = [{pipeline_mode = #tpu.pipeline_mode<synchronous>, transform_indices = @transform_0, window_bounds = array<i64: 16, 16>}, {pipeline_mode = #tpu.pipeline_mode<synchronous>, transform_indices = @transform_1, window_bounds = array<i64: 128, 128>}, {transform_indices = @transform_2, window_bounds = array<i64: 1, 16, 128>}, {transform_indices = @transform_3, window_bounds = array<i64: 1, 16, 128>}, {transform_indices = @transform_4, window_bounds = array<i64: 1, 1, 128>}]} {
    %c0 = arith.constant 0 : index
    %c0_0 = arith.constant 0 : index
    %0 = vector.load %arg1[%c0, %c0_0] : memref<16x16xf32, #tpu.memory_space<vmem>>, vector<16x16xf32>
    %c0_1 = arith.constant 0 : index
    %c0_2 = arith.constant 0 : index
    %1 = vector.load %arg2[%c0_1, %c0_2] : memref<128x128xf32, #tpu.memory_space<vmem>>, vector<128x128xf32>
    %c0_3 = arith.constant 0 : index
    %c0_4 = arith.constant 0 : index
    %c0_5 = arith.constant 0 : index
    %2 = vector.load %arg3[%c0_3, %c0_4, %c0_5] : memref<1x16x128xf32, #tpu.memory_space<vmem>>, vector<1x16x128xf32>
    %3 = vector.shape_cast %2 : vector<1x16x128xf32> to vector<16x128xf32>
    %c0_6 = arith.constant 0 : index
    %c0_7 = arith.constant 0 : index
    %c0_8 = arith.constant 0 : index
    %4 = vector.load %arg4[%c0_6, %c0_7, %c0_8] : memref<1x16x128xf32, #tpu.memory_space<vmem>>, vector<1x16x128xf32>
    %5 = vector.shape_cast %4 : vector<1x16x128xf32> to vector<16x128xf32>
    %cst = arith.constant dense<0.000000e+00> : vector<16x128xf32>
    %6 = tpu.matmul %0, %3, %cst {dimension_numbers = #tpu.dot_dimension_numbers<[1], [0], [0], [1], [0, 0, 1, 1], [], []>} : vector<16x16xf32>, vector<16x128xf32>, vector<16x128xf32> -> vector<16x128xf32>
    %cst_9 = arith.constant dense<0.000000e+00> : vector<16x128xf32>
    %7 = tpu.matmul %6, %1, %cst_9 {dimension_numbers = #tpu.dot_dimension_numbers<[1], [0], [0], [1], [0, 0, 1, 1], [], []>} : vector<16x128xf32>, vector<128x128xf32>, vector<16x128xf32> -> vector<16x128xf32>
    %cst_10 = arith.constant dense<0.000000e+00> : vector<16x128xf32>
    %8 = tpu.matmul %0, %5, %cst_10 {dimension_numbers = #tpu.dot_dimension_numbers<[1], [0], [0], [1], [0, 0, 1, 1], [], []>} : vector<16x16xf32>, vector<16x128xf32>, vector<16x128xf32> -> vector<16x128xf32>
    %cst_11 = arith.constant dense<0.000000e+00> : vector<16x128xf32>
    %9 = tpu.matmul %8, %1, %cst_11 {dimension_numbers = #tpu.dot_dimension_numbers<[1], [0], [0], [1], [0, 0, 1, 1], [], []>} : vector<16x128xf32>, vector<128x128xf32>, vector<16x128xf32> -> vector<16x128xf32>
    %10 = arith.mulf %3, %3 : vector<16x128xf32>
    %cst_12 = arith.constant dense<0.000000e+00> : vector<16x128xf32>
    %11 = tpu.matmul %0, %10, %cst_12 {dimension_numbers = #tpu.dot_dimension_numbers<[1], [0], [0], [1], [0, 0, 1, 1], [], []>} : vector<16x16xf32>, vector<16x128xf32>, vector<16x128xf32> -> vector<16x128xf32>
    %cst_13 = arith.constant dense<0.000000e+00> : vector<16x128xf32>
    %12 = tpu.matmul %11, %1, %cst_13 {dimension_numbers = #tpu.dot_dimension_numbers<[1], [0], [0], [1], [0, 0, 1, 1], [], []>} : vector<16x128xf32>, vector<128x128xf32>, vector<16x128xf32> -> vector<16x128xf32>
    %13 = arith.mulf %5, %5 : vector<16x128xf32>
    %cst_14 = arith.constant dense<0.000000e+00> : vector<16x128xf32>
    %14 = tpu.matmul %0, %13, %cst_14 {dimension_numbers = #tpu.dot_dimension_numbers<[1], [0], [0], [1], [0, 0, 1, 1], [], []>} : vector<16x16xf32>, vector<16x128xf32>, vector<16x128xf32> -> vector<16x128xf32>
    %cst_15 = arith.constant dense<0.000000e+00> : vector<16x128xf32>
    %15 = tpu.matmul %14, %1, %cst_15 {dimension_numbers = #tpu.dot_dimension_numbers<[1], [0], [0], [1], [0, 0, 1, 1], [], []>} : vector<16x128xf32>, vector<128x128xf32>, vector<16x128xf32> -> vector<16x128xf32>
    %16 = arith.mulf %3, %5 : vector<16x128xf32>
    %cst_16 = arith.constant dense<0.000000e+00> : vector<16x128xf32>
    %17 = tpu.matmul %0, %16, %cst_16 {dimension_numbers = #tpu.dot_dimension_numbers<[1], [0], [0], [1], [0, 0, 1, 1], [], []>} : vector<16x16xf32>, vector<16x128xf32>, vector<16x128xf32> -> vector<16x128xf32>
    %cst_17 = arith.constant dense<0.000000e+00> : vector<16x128xf32>
    %18 = tpu.matmul %17, %1, %cst_17 {dimension_numbers = #tpu.dot_dimension_numbers<[1], [0], [0], [1], [0, 0, 1, 1], [], []>} : vector<16x128xf32>, vector<128x128xf32>, vector<16x128xf32> -> vector<16x128xf32>
    %19 = arith.mulf %7, %7 : vector<16x128xf32>
    %20 = arith.mulf %9, %9 : vector<16x128xf32>
    %21 = arith.mulf %7, %9 : vector<16x128xf32>
    %22 = arith.subf %12, %19 : vector<16x128xf32>
    %23 = arith.subf %15, %20 : vector<16x128xf32>
    %24 = arith.subf %18, %21 : vector<16x128xf32>
    %cst_18 = arith.constant 2.000000e+00 : f32
    %25 = vector.broadcast %cst_18 : f32 to vector<16x128xf32>
    %26 = arith.mulf %25, %21 : vector<16x128xf32>
    %cst_19 = arith.constant 9.99999974E-5 : f32
    %27 = vector.broadcast %cst_19 : f32 to vector<16x128xf32>
    %28 = arith.addf %26, %27 : vector<16x128xf32>
    %cst_20 = arith.constant 2.000000e+00 : f32
    %29 = vector.broadcast %cst_20 : f32 to vector<16x128xf32>
    %30 = arith.mulf %29, %24 : vector<16x128xf32>
    %cst_21 = arith.constant 8.99999984E-4 : f32
    %31 = vector.broadcast %cst_21 : f32 to vector<16x128xf32>
    %32 = arith.addf %30, %31 : vector<16x128xf32>
    %33 = arith.mulf %28, %32 : vector<16x128xf32>
    %34 = arith.addf %19, %20 : vector<16x128xf32>
    %cst_22 = arith.constant 9.99999974E-5 : f32
    %35 = vector.broadcast %cst_22 : f32 to vector<16x128xf32>
    %36 = arith.addf %34, %35 : vector<16x128xf32>
    %37 = arith.addf %22, %23 : vector<16x128xf32>
    %cst_23 = arith.constant 8.99999984E-4 : f32
    %38 = vector.broadcast %cst_23 : f32 to vector<16x128xf32>
    %39 = arith.addf %37, %38 : vector<16x128xf32>
    %40 = arith.mulf %36, %39 : vector<16x128xf32>
    %41 = tpu.reciprocal %40 : vector<16x128xf32> -> vector<16x128xf32>
    %42 = arith.mulf %33, %41 : vector<16x128xf32>
    %cst_24 = arith.constant dense<0.000000e+00> : vector<128xf32>
    %43 = vector.multi_reduction <add>, %42, %cst_24 [0] : vector<16x128xf32> to vector<128xf32>
    %44 = vector.shape_cast %43 : vector<128xf32> to vector<1x128xf32>
    %c0_25 = arith.constant 0 : index
    %c0_26 = arith.constant 0 : index
    %c0_27 = arith.constant 0 : index
    %45 = vector.load %arg5[%c0_25, %c0_26, %c0_27] : memref<1x1x128xf32, #tpu.memory_space<vmem>>, vector<1x1x128xf32>
    %46 = vector.shape_cast %45 : vector<1x1x128xf32> to vector<1x128xf32>
    %47 = vector.shape_cast %44 : vector<1x128xf32> to vector<1x1x128xf32>
    tpu.vector_store %arg5[%c0_25, %c0_26, %c0_27], %47 {strides = array<i32>} : memref<1x1x128xf32, #tpu.memory_space<vmem>>, vector<1x1x128xf32>,
    return
  }
  func.func @transform_0(%arg0: i32) -> (i32, i32) {
    %c0_i32 = arith.constant 0 : i32
    %c0_i32_0 = arith.constant 0 : i32
    %c0_i32_1 = arith.constant 0 : i32
    return %c0_i32, %c0_i32_0 : i32, i32
  }
  func.func @transform_1(%arg0: i32) -> (i32, i32) {
    %c0_i32 = arith.constant 0 : i32
    %c0_i32_0 = arith.constant 0 : i32
    %c0_i32_1 = arith.constant 0 : i32
    return %c0_i32, %c0_i32_0 : i32, i32
  }
  func.func @transform_2(%arg0: i32) -> (i32, i32, i32) {
    %c0_i32 = arith.constant 0 : i32
    %c0_i32_0 = arith.constant 0 : i32
    %c0_i32_1 = arith.constant 0 : i32
    return %arg0, %c0_i32, %c0_i32_0 : i32, i32, i32
  }
  func.func @transform_3(%arg0: i32) -> (i32, i32, i32) {
    %c0_i32 = arith.constant 0 : i32
    %c0_i32_0 = arith.constant 0 : i32
    %c0_i32_1 = arith.constant 0 : i32
    return %arg0, %c0_i32, %c0_i32_0 : i32, i32, i32
  }
  func.func @transform_4(%arg0: i32) -> (i32, i32, i32) {
    %c0_i32 = arith.constant 0 : i32
    %c0_i32_0 = arith.constant 0 : i32
    %c0_i32_1 = arith.constant 0 : i32
    return %arg0, %c0_i32, %c0_i32_0 : i32, i32, i32
  }
}

</mosaic_0001>

<bundles_post_ra>
// kernel: tpu_custom_call.1
= control target key start
LH: loop header
LB: loop body
LE: loop exit
PB: predicated region body
PF: predicated region fallthrough
CT: control target
= control target key end

     0   :  { %9 = vsyncpa [#allocation3], 0  ;;  %s748_s0 = inlined_call_operand.hbm [shape: f32[16,16], index: 0, kind: input, shape index: {}]   ;;  %s749_s1 = inlined_call_operand.hbm [shape: f32[128,128], index: 1, kind: input, shape index: {}]   ;;  %s750_s2 = inlined_call_operand.hbm [shape: f32[1,16,128], index: 2, kind: input, shape index: {}]   ;;  %s751_s3 = inlined_call_operand.hbm [shape: f32[1,16,128], index: 3, kind: input, shape index: {}]   ;;  %s752_s4 = inlined_call_operand.hbm [shape: f32[1,1,128], index: 4, kind: output, shape index: {}]  }
   0x1   :  { %10 = vsyncpa [#allocation6], 0 }
   0x2   :  { %11 = vsyncpa [#allocation9], 0 }
   0x3   :  { %12 = vsyncpa [#allocation4], 0  ;;  %s30_s17 = sshll.u32 %s749_s1, 4  ;;  %s584_s18 = smov [#allocation5]   ;;  %s31_s17 = int_to_ptr.hbm [resolvable:$true] %s30_s17 }
   0x4   :  { %s32_s19 = sshll.u32 %s584_s18, 4  ;;  %s17_s22 = sshll.u32 %s748_s0, 4  ;;  %s33_s19 = int_to_ptr.vmem [resolvable:$true] %s32_s19  ;;  %s18_s22 = int_to_ptr.hbm [resolvable:$true] %s17_s22 }
   0x5   :  { %s585_s23 = smov 128   ;;  %s586_s24 = smov 8  }
   0x6   :  { %38 = dma.hbm_to_vmem [thread:$0]  %s31_s17, 2048, %s33_s19, [#allocation6], %s585_s23, %s585_s23, %s586_s24  }
   0x7   :  { %s587_s25 = smov [#allocation2]   ;;  %s43_s29 = sshll.u32 %s750_s2, 4  ;;  %s44_s29 = int_to_ptr.hbm [resolvable:$true] %s43_s29 }
   0x8   :  { %s19_s26 = sshll.u32 %s587_s25, 4  ;;  %s56_s5 = sshll.u32 %s751_s3, 4  ;;  %s20_s26 = int_to_ptr.vmem [resolvable:$true] %s19_s26  ;;  %s57_s5 = int_to_ptr.hbm [resolvable:$true] %s56_s5 }
   0x9   :  { %25 = dma.hbm_to_vmem [thread:$0]  %s18_s22, 256, %s20_s26, [#allocation3], %s585_s23, %s585_s23, %s586_s24  }
   0xa   :  { %s588_s6 = smov [#allocation7]   ;;  %s589_s0 = smov [#allocation8]  }
   0xb   :  { %s45_s7 = sshll.u32 %s588_s6, 4  ;;  %s58_s8 = sshll.u32 %s589_s0, 4  ;;  %s46_s7 = int_to_ptr.vmem [resolvable:$true] %s45_s7  ;;  %s59_s8 = int_to_ptr.vmem [resolvable:$true] %s58_s8 }
   0xc   :  { %51 = dma.hbm_to_vmem [thread:$0]  %s44_s29, 256, %s46_s7, [#allocation6], %s585_s23, %s585_s23, %s586_s24  }
   0xd   :  { %64 = dma.hbm_to_vmem [thread:$0]  %s57_s5, 256, %s59_s8, [#allocation9], %s585_s23, %s585_s23, %s586_s24  }
   0xe   :  { %576 = dma.done.wait [#allocation3], 256  }
   0xf   :  { %577 = vsyncadd [#allocation3], 4294967040 }
  0x10   :  { %578 = dma.done.wait [#allocation6], 2304  }
  0x11   :  { %579 = vsyncadd [#allocation6], 4294964992 }
  0x12   :  { %580 = dma.done.wait [#allocation9], 256  }
  0x13   :  { %581 = vsyncadd [#allocation9], 4294967040  ;;  %v628_v0 = vld [vmem:[#allocation7 + $0x8] sm:$0xff]  ;;  %v630_v1 = vld [vmem:[#allocation7] sm:$0xff]  ;;  %vm103_vm0 = vcmask 130048   ;;  %s590_s2 = smov [#allocation10]  }
  0x14   :  { %124 = vmatpush.msra.mxu2 %v628_v0  ;;  %v203_v2 = vmul.f32 %v628_v0, %v628_v0  ;;  %v635_v3 = vld [vmem:[#allocation2] sm:$0xff]  ;;  %v202_v4 = vmul.f32 %v630_v1, %v630_v1  ;;  %v639_v5 = vld [vmem:[#allocation8 + $0x8] sm:$0xff]  ;;  %v656_v11 = vld [vmem:[#allocation5 + $0x68] sm:$0xff]  ;;  %s421_s3 = sshll.u32 %s590_s2, 4  ;;  %s423_s11 = sshll.u32 %s752_s4, 4  ;;  %s422_s3 = int_to_ptr.vmem [resolvable:$true] %s421_s3  ;;  %s424_s11 = int_to_ptr.hbm [resolvable:$true] %s423_s11 }
  0x15   :  { %v641_v6 = vld [vmem:[#allocation5 + $0x78] sm:$0xff]  ;;  %v251_v7 = vmul.f32 %v639_v5, %v639_v5  ;;  %v646_v8 = vld [vmem:[#allocation5 + $0x70] sm:$0xff]  ;;  %v662_v12 = vld [vmem:[#allocation5 + $0x60] sm:$0xff]  ;;  %v299_v26 = vmul.f32 %v639_v5, %v628_v0 }
  0x16   :  { %125 = vmatpush.msra.mxu2 %v630_v1  ;;  %218 = vmatpush.msra.mxu0 %v203_v2  ;;  %v650_v9 = vld [vmem:[#allocation8] sm:$0xff]  ;;  %v666_v13 = vld [vmem:[#allocation2 + $0x8] sm:$0xff]  ;;  %v681_v16 = vld [vmem:[#allocation5 + $0x48] sm:$0xff] }
  0x17   :  { %435 = vmatmul.msk.f32.vlgmr.msra.gmra.mxu2 %vm103_vm0, %v635_v3  ;;  %133 = vmatpush.msra.mxu1 %v641_v6  ;;  %v250_v10 = vmul.f32 %v650_v9, %v650_v9  ;;  %v668_v14 = vld [vmem:[#allocation5 + $0x58] sm:$0xff]  ;;  %v673_v15 = vld [vmem:[#allocation5 + $0x50] sm:$0xff]  ;;  %v688_v17 = vld [vmem:[#allocation5 + $0x40] sm:$0xff]  ;;  %v298_v27 = vmul.f32 %v650_v9, %v630_v1 }
  0x18   :  { %170 = vmatpush.msrb.mxu2 %v639_v5  ;;  %219 = vmatpush.msra.mxu0 %v202_v4  ;;  %v694_v18 = vld [vmem:[#allocation5 + $0x38] sm:$0xff]  ;;  %v89_v19 = vld [vmem:[#allocation5 + $0x30] sm:$0xff]  ;;  %v88_v20 = vld [vmem:[#allocation5 + $0x28] sm:$0xff] }
  0x19   :  { %439 = vmatmul.msk.f32.vlgmr.msra.gmra.mxu0 %vm103_vm0, %v635_v3  ;;  %134 = vmatpush.msra.mxu1 %v646_v8  ;;  %v87_v21 = vld [vmem:[#allocation5 + $0x20] sm:$0xff]  ;;  %v86_v22 = vld [vmem:[#allocation5 + $0x18] sm:$0xff]  ;;  %v85_v23 = vld [vmem:[#allocation5 + $0x10] sm:$0xff] }
  0x1a   :  { %171 = vmatpush.msrb.mxu2 %v650_v9  ;;  %266 = vmatpush.msrb.mxu0 %v251_v7  ;;  %v84_v24 = vld [vmem:[#allocation5 + $0x8] sm:$0xff]  ;;  %v83_v25 = vld [vmem:[#allocation5] sm:$0xff] }
  0x1b   :  { %135 = vmatpush.msra.mxu1 %v656_v11  ;;  %179 = vmatpush.msra.mxu3 %v641_v6 }
  0x1c   :  { %227 = vmatpush.msra.mxu2 %v641_v6  ;;  %267 = vmatpush.msrb.mxu0 %v250_v10 }
  0x1d   :  { %136 = vmatpush.msra.mxu1 %v662_v12  ;;  %180 = vmatpush.msra.mxu3 %v646_v8 }
  0x1e   :  { %228 = vmatpush.msra.mxu2 %v646_v8  ;;  %323 = vmatpush.msra.mxu0 %v641_v6 }
  0x1f   :  { %436 = vmatmul.msk.f32.gmra.mxu2 %vm103_vm0, %v666_v13  ;;  %137 = vmatpush.msra.mxu1 %v668_v14 }
  0x20   :  { %229 = vmatpush.msra.mxu2 %v656_v11  ;;  %181 = vmatpush.msra.mxu3 %v656_v11 }
  0x21   :  { %440 = vmatmul.msk.f32.gmra.mxu0 %vm103_vm0, %v666_v13  ;;  %138 = vmatpush.msra.mxu1 %v673_v15 }
  0x22   :  { %230 = vmatpush.msra.mxu2 %v662_v12  ;;  %182 = vmatpush.msra.mxu3 %v662_v12 }
  0x23   :  { %139 = vmatpush.msra.mxu1 %v681_v16  ;;  %324 = vmatpush.msra.mxu0 %v646_v8 }
  0x24   :  { %231 = vmatpush.msra.mxu2 %v668_v14  ;;  %183 = vmatpush.msra.mxu3 %v668_v14 }
  0x25   :  { %140 = vmatpush.msra.mxu1 %v688_v17  ;;  %325 = vmatpush.msra.mxu0 %v656_v11 }
  0x26   :  { %232 = vmatpush.msra.mxu2 %v673_v15  ;;  %184 = vmatpush.msra.mxu3 %v673_v15 }
  0x27   :  { %437 = vmatmul.msk.f32.vlgmr.msrb.gmra.mxu2 %vm103_vm0, %v635_v3  ;;  %141 = vmatpush.msra.mxu1 %v694_v18 }
  0x28   :  { %233 = vmatpush.msra.mxu2 %v681_v16  ;;  %185 = vmatpush.msra.mxu3 %v681_v16 }
  0x29   :  { %441 = vmatmul.msk.f32.vlgmr.msrb.gmra.mxu0 %vm103_vm0, %v635_v3  ;;  %142 = vmatpush.msra.mxu1 %v89_v19 }
  0x2a   :  { %234 = vmatpush.msra.mxu2 %v688_v17  ;;  %186 = vmatpush.msra.mxu3 %v688_v17 }
  0x2b   :  { %143 = vmatpush.msra.mxu1 %v88_v20  ;;  %326 = vmatpush.msra.mxu0 %v662_v12 }
  0x2c   :  { %235 = vmatpush.msra.mxu2 %v694_v18  ;;  %187 = vmatpush.msra.mxu3 %v694_v18 }
  0x2d   :  { %144 = vmatpush.msra.mxu1 %v87_v21  ;;  %327 = vmatpush.msra.mxu0 %v668_v14 }
  0x2e   :  { %236 = vmatpush.msra.mxu2 %v89_v19  ;;  %188 = vmatpush.msra.mxu3 %v89_v19 }
  0x2f   :  { %438 = vmatmul.msk.f32.gmra.mxu2 %vm103_vm0, %v666_v13  ;;  %145 = vmatpush.msra.mxu1 %v86_v22 }
  0x30   :  { %237 = vmatpush.msra.mxu2 %v88_v20  ;;  %189 = vmatpush.msra.mxu3 %v88_v20 }
  0x31   :  { %442 = vmatmul.msk.f32.gmra.mxu0 %vm103_vm0, %v666_v13  ;;  %146 = vmatpush.msra.mxu1 %v85_v23 }
  0x32   :  { %238 = vmatpush.msra.mxu2 %v87_v21  ;;  %190 = vmatpush.msra.mxu3 %v87_v21 }
  0x33   :  { %147 = vmatpush.msra.mxu1 %v84_v24  ;;  %328 = vmatpush.msra.mxu0 %v673_v15 }
  0x34   :  { %239 = vmatpush.msra.mxu2 %v86_v22  ;;  %191 = vmatpush.msra.mxu3 %v86_v22 }
  0x35   :  { %148 = vmatpush.msra.mxu1 %v83_v25  ;;  %329 = vmatpush.msra.mxu0 %v681_v16 }
  0x36   :  { %240 = vmatpush.msra.mxu2 %v85_v23  ;;  %192 = vmatpush.msra.mxu3 %v85_v23 }
  0x37   :  { %275 = vmatpush.msrb.mxu1 %v641_v6  ;;  %330 = vmatpush.msra.mxu0 %v688_v17 }
  0x38   :  { %241 = vmatpush.msra.mxu2 %v84_v24  ;;  %193 = vmatpush.msra.mxu3 %v84_v24 }
  0x39   :  { %276 = vmatpush.msrb.mxu1 %v646_v8  ;;  %331 = vmatpush.msra.mxu0 %v694_v18 }
  0x3a   :  { %242 = vmatpush.msra.mxu2 %v83_v25  ;;  %194 = vmatpush.msra.mxu3 %v83_v25 }
  0x3b   :  { %277 = vmatpush.msrb.mxu1 %v656_v11  ;;  %332 = vmatpush.msra.mxu0 %v89_v19 }
  0x3c   :  { %314 = vmatpush.msrb.mxu3 %v299_v26 }
  0x3d   :  { %278 = vmatpush.msrb.mxu1 %v662_v12  ;;  %333 = vmatpush.msra.mxu0 %v88_v20 }
  0x3e   :  { %315 = vmatpush.msrb.mxu3 %v298_v27 }
  0x3f   :  { %279 = vmatpush.msrb.mxu1 %v668_v14  ;;  %334 = vmatpush.msra.mxu0 %v87_v21 }
  0x41   :  { %280 = vmatpush.msrb.mxu1 %v673_v15  ;;  %335 = vmatpush.msra.mxu0 %v86_v22 }
  0x43   :  { %281 = vmatpush.msrb.mxu1 %v681_v16  ;;  %336 = vmatpush.msra.mxu0 %v85_v23 }
  0x45   :  { %282 = vmatpush.msrb.mxu1 %v688_v17  ;;  %337 = vmatpush.msra.mxu0 %v84_v24 }
  0x47   :  { %283 = vmatpush.msrb.mxu1 %v694_v18  ;;  %338 = vmatpush.msra.mxu0 %v83_v25 }
  0x49   :  { %284 = vmatpush.msrb.mxu1 %v89_v19 }
  0x4b   :  { %285 = vmatpush.msrb.mxu1 %v88_v20 }
  0x4d   :  { %286 = vmatpush.msrb.mxu1 %v87_v21 }
  0x4f   :  { %287 = vmatpush.msrb.mxu1 %v86_v22 }
  0x51   :  { %288 = vmatpush.msrb.mxu1 %v85_v23 }
  0x53   :  { %289 = vmatpush.msrb.mxu1 %v84_v24 }
  0x55   :  { %290 = vmatpush.msrb.mxu1 %v83_v25 }
  0x96   :  { %v221_v28 = vpop.f32.mrf.mxu0 }
  0x97   :  { %243 = vmatmul.f32.vlgmr.msra.gmra.mxu2 %v221_v28 }
  0x9a   :  { %v127_v29 = vpop.f32.mrf.mxu2 }
  0x9b   :  { %149 = vmatmul.f32.vlgmr.msra.gmra.mxu1 %v127_v29 }
  0x9e   :  { %v224_v30 = vpop.f32.mrf.mxu0 }
  0x9f   :  { %246 = vmatmul.f32.gmra.mxu2 %v224_v30 }
  0xa2   :  { %v130_v31 = vpop.f32.mrf.mxu2 }
  0xa3   :  { %152 = vmatmul.f32.gmra.mxu1 %v130_v31 }
  0xa6   :  { %v269_v32 = vpop.f32.mrf.mxu0 }
  0xaa   :  { %v173_v33 = vpop.f32.mrf.mxu2 }
  0xab   :  { %195 = vmatmul.f32.vlgmr.msra.gmra.mxu3 %v173_v33  ;;  %291 = vmatmul.f32.vlgmr.msrb.gmra.mxu1 %v269_v32 }
  0xae   :  { %v272_v34 = vpop.f32.mrf.mxu0 }
  0xb2   :  { %v176_v35 = vpop.f32.mrf.mxu2 }
  0xb3   :  { %198 = vmatmul.f32.gmra.mxu3 %v176_v35  ;;  %294 = vmatmul.f32.gmra.mxu1 %v272_v34 }
  0xbb   :  { %443 = vmatmul.msk.f32.vlgmr.msrb.gmra.mxu3 %vm103_vm0, %v635_v3 }
  0xc3   :  { %444 = vmatmul.msk.f32.gmra.mxu3 %vm103_vm0, %v666_v13 }
 0x118   :  { %v150_v40 = vpop.f32.mrf.mxu1 }
 0x119   :  { %v346_v46 = vmul.f32 %v150_v40, %v150_v40 }
 0x11a   :  { %v244_v43 = vpop.f32.mrf.mxu2 }
 0x11b   :  { %v352_v52 = vsub.f32 %v244_v43, %v346_v46 }
 0x120   :  { %v153_v41 = vpop.f32.mrf.mxu1 }
 0x121   :  { %v347_v48 = vmul.f32 %v153_v41, %v153_v41 }
 0x122   :  { %v247_v49 = vpop.f32.mrf.mxu2 }
 0x123   :  { %v353_v53 = vsub.f32 %v247_v49, %v347_v48 }
 0x128   :  { %v292_v42 = vpop.f32.mrf.mxu1 }
 0x12e   :  { %v196_v36 = vpop.f32.mrf.mxu3 }
 0x12f   :  { %v348_v44 = vmul.f32 %v196_v36, %v196_v36  ;;  %v350_v4 = vmul.f32 %v196_v36, %v150_v40 }
 0x130   :  { %v295_v47 = vpop.f32.mrf.mxu1 }
 0x131   :  { %v354_v50 = vsub.f32 %v292_v42, %v348_v44  ;;  %v368_v56 = vadd.f32 %v348_v44, %v346_v46  ;;  %v358_v13 = vmul.f32 2.0, %v350_v4 }
 0x133   :  { %v372_v54 = vadd.f32 %v354_v50, %v352_v52  ;;  %v370_v60 = vadd.f32 0.0001, %v368_v56  ;;  %v360_v20 = vadd.f32 0.0001, %v358_v13 }
 0x135   :  { %v374_v58 = vadd.f32 0.0009, %v372_v54 }
 0x136   :  { %v199_v37 = vpop.f32.mrf.mxu3 }
 0x137   :  { %v349_v45 = vmul.f32 %v199_v37, %v199_v37  ;;  %v376_v62 = vmul.f32 %v374_v58, %v370_v60  ;;  %v351_v9 = vmul.f32 %v199_v37, %v153_v41 }
 0x139   :  { %v355_v51 = vsub.f32 %v295_v47, %v349_v45  ;;  %v369_v57 = vadd.f32 %v349_v45, %v347_v48  ;;  %452 = vrcp.f32 %v376_v62  ;;  %v359_v14 = vmul.f32 2.0, %v351_v9 }
 0x13a   :  { %vm383_vm3 = vweird.f32 %v376_v62  ;;  %v389_v21 = vand.u32 2147483648, %v376_v62  ;;  %v387_v24 = vand.u32 2147483647, %v376_v62 }
 0x13b   :  { %v373_v55 = vadd.f32 %v355_v51, %v353_v53  ;;  %v371_v61 = vadd.f32 0.0001, %v369_v57  ;;  %v361_v27 = vadd.f32 0.0001, %v359_v14 }
 0x13c   :  { %v390_v32 = vor.u32 1.1754944e-38, %v389_v21  ;;  %vm388_vm7 = vcmp.eq.f32.partialorder %v387_v24, 8.507059e+37 }
 0x13d   :  { %v375_v59 = vadd.f32 0.0009, %v373_v55 }
 0x13e   :  { %v317_v38 = vpop.f32.mrf.mxu3 }
 0x13f   :  { %339 = vmatmul.f32.vlgmr.msra.gmra.mxu0 %v317_v38  ;;  %v377_v63 = vmul.f32 %v375_v59, %v371_v61  ;;  %v453_v0 = vpop.eup %452 }
 0x140   :  { %v379_v2 = vmul.f32 %v453_v0, %v376_v62  ;;  %vm384_vm1 = vweird.f32 %v453_v0 }
 0x141   :  { %454 = vrcp.f32 %v377_v63  ;;  %v403_v22 = vand.u32 2147483648, %v377_v63  ;;  %vm739_vm4 = vmor %vm383_vm3, %vm384_vm1  ;;  %vm397_vm5 = vweird.f32 %v377_v63  ;;  %v401_v26 = vand.u32 2147483647, %v377_v63 }
 0x142   :  { %v380_v6 = vsub.f32 1.0, %v379_v2 }
 0x143   :  { %v404_v33 = vor.u32 1.1754944e-38, %v403_v22  ;;  %vm402_vm8 = vcmp.eq.f32.partialorder %v401_v26, 8.507059e+37 }
 0x144   :  { %v381_v10 = vmul.f32 %v453_v0, %v380_v6 }
 0x146   :  { %v320_v39 = vpop.f32.mrf.mxu3  ;;  %v382_v15 = vadd.f32 %v453_v0, %v381_v10 }
 0x147   :  { %342 = vmatmul.f32.gmra.mxu0 %v320_v39  ;;  %v455_v1 = vpop.eup %454 }
 0x148   :  { %v393_v3 = vmul.f32 %v455_v1, %v377_v63  ;;  %vm398_vm2 = vweird.f32 %v455_v1  ;;  %v386_v29 = vsel %vm739_vm4, %v453_v0, %v382_v15 }
 0x149   :  { %vm399_vm6 = vmor %vm397_vm5, %vm398_vm2  ;;  %v391_v35 = vsel %vm388_vm7, %v390_v32, %v386_v29 }
 0x14a   :  { %v394_v8 = vsub.f32 1.0, %v393_v3 }
 0x14c   :  { %v395_v12 = vmul.f32 %v455_v1, %v394_v8 }
 0x14e   :  { %v396_v19 = vadd.f32 %v455_v1, %v395_v12 }
 0x150   :  { %v400_v31 = vsel %vm399_vm6, %v455_v1, %v396_v19 }
 0x151   :  { %v405_v36 = vsel %vm402_vm8, %v404_v33, %v400_v31 }
 0x1bc   :  { %v340_v5 = vpop.f32.mrf.mxu0 }
 0x1bd   :  { %v356_v7 = vsub.f32 %v340_v5, %v350_v4 }
 0x1bf   :  { %v362_v11 = vmul.f32 2.0, %v356_v7 }
 0x1c1   :  { %v364_v17 = vadd.f32 0.0009, %v362_v11 }
 0x1c3   :  { %v366_v28 = vmul.f32 %v364_v17, %v360_v20 }
 0x1c4   :  { %v343_v16 = vpop.f32.mrf.mxu0 }
 0x1c5   :  { %v357_v18 = vsub.f32 %v343_v16, %v351_v9  ;;  %v406_v37 = vmul.f32 %v391_v35, %v366_v28 }
 0x1c7   :  { %v363_v25 = vmul.f32 2.0, %v357_v18 }
 0x1c9   :  { %v365_v30 = vadd.f32 0.0009, %v363_v25 }
 0x1cb   :  { %v367_v34 = vmul.f32 %v365_v30, %v361_v27 }
 0x1cd   :  { %v407_v38 = vmul.f32 %v405_v36, %v367_v34 }
 0x1cf   :  { %v408_v39 = vadd.f32 %v407_v38, %v406_v37 }
 0x1d1   :  { %v409_v40 = vrot.slane %v408_v39, 4 }
 0x1d3   :  { %v410_v41 = vadd.f32 %v409_v40, %v408_v39 }
 0x1d5   :  { %v411_v42 = vrot.slane %v410_v41, 2 }
 0x1d7   :  { %v412_v43 = vadd.f32 %v411_v42, %v410_v41 }
 0x1d9   :  { %v413_v44 = vrot.slane %v412_v43, 1 }
 0x1db   :  { %v414_v45 = vadd.f32 %v413_v44, %v412_v43 }
 0x1dd   :  { %415 = vst [vmem:[#allocation10] sm:$0x1] %v414_v45 }
 0x1de   :  { %426 = dma.vmem_to_hbm [thread:$0]  %s422_s3, 16, %s424_s11, [#allocation4]  }
 0x1df   :  { %582 = dma.done.wait [#allocation4], 16  }
 0x1e0   :  { %583 = vsyncadd [#allocation4], 4294967280 }
 0x1e1   :  { %431 = vsyncpa [#allocation3], 1 }
 0x1e2   :  { %432 = vsyncpa [#allocation6], 1 }
 0x1e3   :  { %433 = vsyncpa [#allocation9], 1 }
 0x1e4   :  { %434 = vsyncpa [#allocation4], 1 }

</bundles_post_ra>
